<compile_context>
chip_gen: v6e
topology: v6e:2x2x1
jax: 0.10.0
libtpu: 0.0.40
codegen_flags: <defaults>
</compile_context>

<pallas_src>
import functools

import jax
import jax.numpy as jnp
from jax.experimental import pallas as pl
from jax.experimental.pallas import tpu as pltpu


def _log_sigmoid(x):
    # Numerically stable log(sigmoid(x)) = min(x, 0) - log1p(exp(-|x|))
    return jnp.minimum(x, 0.0) - jnp.log1p(jnp.exp(-jnp.abs(x)))


def _line_loss_kernel(u_ref, pos_ref, neg_ref, out_ref, *, batch, num_neg, tile):
    i = pl.program_id(0)

    u = u_ref[...].astype(jnp.float32)        # (TB, D)
    pv = pos_ref[...].astype(jnp.float32)     # (TB, D)

    # per_row[b] = log_sigmoid(<u_b, pos_b>) + (1/K) * sum_k log_sigmoid(-<u_b, neg_bk>)
    per_row = _log_sigmoid(jnp.sum(u * pv, axis=-1, keepdims=True))     # (TB, 1)
    inv_k = 1.0 / num_neg
    for k in range(num_neg):                   # small static unroll over negatives
        nv = neg_ref[k].astype(jnp.float32)    # (TB, D): one f32 temp live at a time
        ns = jnp.sum(u * nv, axis=-1, keepdims=True)                    # (TB, 1)
        per_row = per_row + inv_k * _log_sigmoid(-ns)

    if batch % tile != 0:
        # Only the last tile can contain padded (undefined) rows.
        last = pl.num_programs(0) - 1

        @pl.when(i == last)
        def _():
            rows = jax.lax.broadcasted_iota(jnp.int32, (tile, 1), 0) + i * tile
            masked = jnp.where(rows < batch, per_row, 0.0)
            out_ref[...] = jnp.sum(masked, axis=0, keepdims=True)[None]

        @pl.when(i != last)
        def _():
            out_ref[...] = jnp.sum(per_row, axis=0, keepdims=True)[None]
    else:
        out_ref[...] = jnp.sum(per_row, axis=0, keepdims=True)[None]


def _round_up(x, m):
    return ((x + m - 1) // m) * m


def _vmem_budget_bytes():
    """Per-generation VMEM sizing: ~70% of capacity for double-buffered blocks
    + f32 temporaries, ~90% as the explicit scoped-VMEM compiler limit.
    v5e/v6e: 128 MiB -> ~90 MiB block budget; v7x: 64 MiB -> ~45 MiB."""
    cap = 64 * 1024 * 1024  # conservative fallback (v7x per-TensorCore VMEM)
    try:
        info = pltpu.get_tpu_info()
        cap = int(getattr(info, "vmem_capacity_bytes", cap)) or cap
    except Exception:
        pass
    return int(cap * 0.70), int(cap * 0.90)


def _pick_tile(batch, num_neg, dim, itemsize, budget_bytes):
    # VMEM bytes per batch row:
    #   * double-buffered input blocks: u + pos + K negatives (transfer dtype)
    #   * live f32 temporaries (u, pos, one neg slice, misc)
    # Lane padding: a (TB, D) tile occupies round_up(D, 128) lanes in VMEM.
    d_eff = _round_up(dim, 128)
    per_row = 2 * (2 + num_neg) * d_eff * itemsize + 4 * d_eff * 4
    tb = budget_bytes // max(per_row, 1)
    tb = max(8, min(tb, 2048))                 # >=512 rows is already ~85% of HBM roofline
    tb = (tb // 8) * 8                         # sublane-aligned
    if batch < 8:
        tb = batch                             # single full block (block dim == array dim)
    else:
        tb = min(tb, (batch // 8) * 8)         # never exceed the batch
    return tb


def line_forward_pallas(emb_u, emb_pos_v, emb_neg_v):
    """LINE loss from already-gathered embeddings.

    emb_u, emb_pos_v : (B, D)
    emb_neg_v        : (K, B, D)  negatives with K on the leading axis, so each
                                   tile is a dense (TB, D) slab.
    """
    B, D = emb_u.shape
    K, Bn, Dn = emb_neg_v.shape
    assert Bn == B and Dn == D

    itemsize = jnp.dtype(emb_u.dtype).itemsize
    block_budget, vmem_limit = _vmem_budget_bytes()
    tb = _pick_tile(B, K, D, itemsize, block_budget)
    num_tiles = pl.cdiv(B, tb)

    kernel = functools.partial(_line_loss_kernel, batch=B, num_neg=K, tile=tb)

    partials = pl.pallas_call(
        kernel,
        out_shape=jax.ShapeDtypeStruct((num_tiles, 1, 1), jnp.float32),
        grid_spec=pltpu.PrefetchScalarGridSpec(
            num_scalar_prefetch=0,
            grid=(num_tiles,),
            in_specs=[
                pl.BlockSpec((tb, D), lambda i: (i, 0)),
                pl.BlockSpec((tb, D), lambda i: (i, 0)),
                pl.BlockSpec((K, tb, D), lambda i: (0, i, 0)),
            ],
            out_specs=pl.BlockSpec((1, 1, 1), lambda i: (i, 0, 0)),
        ),
        compiler_params=pltpu.CompilerParams(
            # Independent per-tile partials: megacore-splittable on v7x,
            # harmless (sequential) on single-TC v5e/v6e.
            dimension_semantics=("parallel",),
            vmem_limit_bytes=vmem_limit,
        ),
    )(emb_u, emb_pos_v, emb_neg_v)

    # Unscaled f32 partial sums in-kernel; normalize by B exactly once here.
    return -(jnp.sum(partials) / B)


@functools.partial(jax.jit, static_argnames=("transfer_dtype",))
def _line_loss_from_tables(u_table, ctx_table, pos_u, pos_v, neg_v, *, transfer_dtype):
    # Embedding gathers stay in XLA (see TODO at top of file); casting the
    # gathered activations to bf16 halves their HBM write + kernel read.
    emb_u = jnp.take(u_table, pos_u, axis=0).astype(transfer_dtype)          # (B, D)
    emb_pos_v = jnp.take(ctx_table, pos_v, axis=0).astype(transfer_dtype)    # (B, D)
    # Gather negatives with K leading -> (K, B, D): dense (TB, D) tiles.
    emb_neg_v = jnp.take(ctx_table, jnp.transpose(neg_v), axis=0).astype(transfer_dtype)
    return line_forward_pallas(emb_u, emb_pos_v, emb_neg_v)


class LinePallas:
    """JAX/Pallas port of the PyTorch LINE module's forward pass."""

    def __init__(self, num_nodes, embedding_dim, order=1, key=None,
                 param_dtype=jnp.float32, transfer_dtype=jnp.bfloat16):
        assert order in (1, 2)
        self.num_nodes = num_nodes
        self.embedding_dim = embedding_dim
        self.order = order
        self.transfer_dtype = transfer_dtype
        if key is None:
            key = jax.random.PRNGKey(0)
        initrange = 0.5 / embedding_dim
        ku, kv = jax.random.split(key)
        self.u_embeddings = jax.random.uniform(
            ku, (num_nodes, embedding_dim), jnp.float32, -initrange, initrange
        ).astype(param_dtype)
        if order == 2:
            self.v_embeddings = jax.random.uniform(
                kv, (num_nodes, embedding_dim), jnp.float32, -initrange, initrange
            ).astype(param_dtype)
        else:
            self.v_embeddings = None

    def __call__(self, pos_u, pos_v, neg_v):
        table = self.u_embeddings if self.order == 1 else self.v_embeddings
        return _line_loss_from_tables(
            self.u_embeddings, table, pos_u, pos_v, neg_v,
            transfer_dtype=self.transfer_dtype,
        )

    def get_embeddings(self):
        if self.order == 1:
            return self.u_embeddings
        return (self.u_embeddings + self.v_embeddings) / 2


def _reference_loss(model, pos_u, pos_v, neg_v):
    # Pure-JAX f32 mirror of the PyTorch forward for sanity checking.
    u_tab = model.u_embeddings.astype(jnp.float32)
    ctx = (model.u_embeddings if model.order == 1 else model.v_embeddings).astype(jnp.float32)
    emb_u = jnp.take(u_tab, pos_u, axis=0)
    emb_pos_v = jnp.take(ctx, pos_v, axis=0)
    emb_neg_v = jnp.take(ctx, neg_v, axis=0)                        # (B, K, D)
    pos_score = jax.nn.log_sigmoid(jnp.sum(emb_u * emb_pos_v, axis=1))
    neg_score = jax.nn.log_sigmoid(-jnp.sum(emb_u[:, None, :] * emb_neg_v, axis=2))
    return -(jnp.mean(pos_score) + jnp.mean(neg_score))


if __name__ == "__main__":
    num_nodes = 64
    embedding_dim = 32
    batch = 8
    num_neg = 4

    key = jax.random.PRNGKey(0)
    k_model, k_u, k_v, k_n = jax.random.split(key, 4)

    pos_u = jax.random.randint(k_u, (batch,), 0, num_nodes, dtype=jnp.int32)
    pos_v = jax.random.randint(k_v, (batch,), 0, num_nodes, dtype=jnp.int32)
    neg_v = jax.random.randint(k_n, (batch, num_neg), 0, num_nodes, dtype=jnp.int32)

    # Default path: bf16 HBM transfers (bandwidth-optimized), f32 math in-kernel.
    model = LinePallas(num_nodes, embedding_dim, order=1, key=k_model)
    loss = jax.block_until_ready(model(pos_u, pos_v, neg_v))
    ref = _reference_loss(model, pos_u, pos_v, neg_v)
    assert jnp.allclose(loss, ref, atol=2e-3, rtol=2e-3), (loss, ref)

    # f32-transfer path matches the f32 reference tightly.
    model_f32 = LinePallas(num_nodes, embedding_dim, order=1, key=k_model,
                           transfer_dtype=jnp.float32)
    loss_f32 = jax.block_until_ready(model_f32(pos_u, pos_v, neg_v))
    ref_f32 = _reference_loss(model_f32, pos_u, pos_v, neg_v)
    assert jnp.allclose(loss_f32, ref_f32, atol=1e-5, rtol=1e-5), (loss_f32, ref_f32)

    # Ragged batch (not a multiple of the tile / sublane size) exercises the
    # partial-last-block + mask path (no jnp.pad copies anymore).
    batch2 = 13
    k2u, k2v, k2n = jax.random.split(jax.random.PRNGKey(1), 3)
    pos_u2 = jax.random.randint(k2u, (batch2,), 0, num_nodes, dtype=jnp.int32)
    pos_v2 = jax.random.randint(k2v, (batch2,), 0, num_nodes, dtype=jnp.int32)
    neg_v2 = jax.random.randint(k2n, (batch2, num_neg), 0, num_nodes, dtype=jnp.int32)
    loss2 = jax.block_until_ready(model(pos_u2, pos_v2, neg_v2))
    ref2 = _reference_loss(model, pos_u2, pos_v2, neg_v2)
    assert jnp.allclose(loss2, ref2, atol=2e-3, rtol=2e-3), (loss2, ref2)

    # order=2 only swaps the context embedding table; same kernel.
    model2 = LinePallas(num_nodes, embedding_dim, order=2, key=k_model)
    loss3 = jax.block_until_ready(model2(pos_u, pos_v, neg_v))
    ref3 = _reference_loss(model2, pos_u, pos_v, neg_v)
    assert jnp.allclose(loss3, ref3, atol=2e-3, rtol=2e-3), (loss3, ref3)

    print("KERNEL_OK")
</pallas_src>

<mosaic_0001>
module attributes {stable_mosaic.version = 11 : i64} {
  func.func @_line_loss_kernel(%arg0: i32, %arg1: memref<8x32xbf16, #tpu.memory_space<vmem>>, %arg2: memref<8x32xbf16, #tpu.memory_space<vmem>>, %arg3: memref<4x8x32xbf16, #tpu.memory_space<vmem>>, %arg4: memref<1x1x1xf32, #tpu.memory_space<vmem>>) attributes {dimension_semantics = [#tpu.dimension_semantics<parallel>], iteration_bounds = array<i64: 1>, scalar_prefetch = 0 : i64, scratch_operands = 0 : i64, tpu.core_type = #tpu.core_type<tc>, window_params = [{transform_indices = @transform_0, window_bounds = array<i64: 8, 32>}, {transform_indices = @transform_1, window_bounds = array<i64: 8, 32>}, {transform_indices = @transform_2, window_bounds = array<i64: 4, 8, 32>}, {transform_indices = @transform_3, window_bounds = array<i64: 1, 1, 1>}]} {
    %c0 = arith.constant 0 : index
    %c0_0 = arith.constant 0 : index
    %0 = vector.load %arg1[%c0, %c0_0] : memref<8x32xbf16, #tpu.memory_space<vmem>>, vector<8x32xbf16>
    %1 = arith.extf %0 : vector<8x32xbf16> to vector<8x32xf32>
    %c0_1 = arith.constant 0 : index
    %c0_2 = arith.constant 0 : index
    %2 = vector.load %arg2[%c0_1, %c0_2] : memref<8x32xbf16, #tpu.memory_space<vmem>>, vector<8x32xbf16>
    %3 = arith.extf %2 : vector<8x32xbf16> to vector<8x32xf32>
    %4 = arith.mulf %1, %3 : vector<8x32xf32>
    %cst = arith.constant dense<0.000000e+00> : vector<8xf32>
    %5 = vector.multi_reduction <add>, %4, %cst [1] : vector<8x32xf32> to vector<8xf32>
    %6 = vector.shape_cast %5 : vector<8xf32> to vector<8x1xf32>
    %cst_3 = arith.constant 0.000000e+00 : f32
    %7 = vector.broadcast %cst_3 : f32 to vector<8x1xf32>
    %8 = arith.minimumf %6, %7 : vector<8x1xf32>
    %9 = math.absf %6 : vector<8x1xf32>
    %cst_4 = arith.constant 0.000000e+00 : f32
    %10 = vector.broadcast %cst_4 : f32 to vector<8x1xf32>
    %11 = arith.subf %10, %9 : vector<8x1xf32>
    %12 = math.exp %11 : vector<8x1xf32>
    %13 = math.log1p %12 : vector<8x1xf32>
    %14 = arith.subf %8, %13 : vector<8x1xf32>
    %c0_5 = arith.constant 0 : index
    %c0_6 = arith.constant 0 : index
    %c0_7 = arith.constant 0 : index
    %15 = vector.load %arg3[%c0_5, %c0_6, %c0_7] : memref<4x8x32xbf16, #tpu.memory_space<vmem>>, vector<1x8x32xbf16>
    %16 = vector.shape_cast %15 : vector<1x8x32xbf16> to vector<8x32xbf16>
    %17 = arith.extf %16 : vector<8x32xbf16> to vector<8x32xf32>
    %18 = arith.mulf %1, %17 : vector<8x32xf32>
    %cst_8 = arith.constant dense<0.000000e+00> : vector<8xf32>
    %19 = vector.multi_reduction <add>, %18, %cst_8 [1] : vector<8x32xf32> to vector<8xf32>
    %20 = vector.shape_cast %19 : vector<8xf32> to vector<8x1xf32>
    %cst_9 = arith.constant 0.000000e+00 : f32
    %21 = vector.broadcast %cst_9 : f32 to vector<8x1xf32>
    %22 = arith.subf %21, %20 : vector<8x1xf32>
    %cst_10 = arith.constant 0.000000e+00 : f32
    %23 = vector.broadcast %cst_10 : f32 to vector<8x1xf32>
    %24 = arith.minimumf %22, %23 : vector<8x1xf32>
    %25 = math.absf %22 : vector<8x1xf32>
    %cst_11 = arith.constant 0.000000e+00 : f32
    %26 = vector.broadcast %cst_11 : f32 to vector<8x1xf32>
    %27 = arith.subf %26, %25 : vector<8x1xf32>
    %28 = math.exp %27 : vector<8x1xf32>
    %29 = math.log1p %28 : vector<8x1xf32>
    %30 = arith.subf %24, %29 : vector<8x1xf32>
    %cst_12 = arith.constant 2.500000e-01 : f32
    %31 = vector.broadcast %cst_12 : f32 to vector<8x1xf32>
    %32 = arith.mulf %31, %30 : vector<8x1xf32>
    %33 = arith.addf %14, %32 : vector<8x1xf32>
    %c1 = arith.constant 1 : index
    %c0_13 = arith.constant 0 : index
    %c0_14 = arith.constant 0 : index
    %34 = vector.load %arg3[%c1, %c0_13, %c0_14] : memref<4x8x32xbf16, #tpu.memory_space<vmem>>, vector<1x8x32xbf16>
    %35 = vector.shape_cast %34 : vector<1x8x32xbf16> to vector<8x32xbf16>
    %36 = arith.extf %35 : vector<8x32xbf16> to vector<8x32xf32>
    %37 = arith.mulf %1, %36 : vector<8x32xf32>
    %cst_15 = arith.constant dense<0.000000e+00> : vector<8xf32>
    %38 = vector.multi_reduction <add>, %37, %cst_15 [1] : vector<8x32xf32> to vector<8xf32>
    %39 = vector.shape_cast %38 : vector<8xf32> to vector<8x1xf32>
    %cst_16 = arith.constant 0.000000e+00 : f32
    %40 = vector.broadcast %cst_16 : f32 to vector<8x1xf32>
    %41 = arith.subf %40, %39 : vector<8x1xf32>
    %cst_17 = arith.constant 0.000000e+00 : f32
    %42 = vector.broadcast %cst_17 : f32 to vector<8x1xf32>
    %43 = arith.minimumf %41, %42 : vector<8x1xf32>
    %44 = math.absf %41 : vector<8x1xf32>
    %cst_18 = arith.constant 0.000000e+00 : f32
    %45 = vector.broadcast %cst_18 : f32 to vector<8x1xf32>
    %46 = arith.subf %45, %44 : vector<8x1xf32>
    %47 = math.exp %46 : vector<8x1xf32>
    %48 = math.log1p %47 : vector<8x1xf32>
    %49 = arith.subf %43, %48 : vector<8x1xf32>
    %cst_19 = arith.constant 2.500000e-01 : f32
    %50 = vector.broadcast %cst_19 : f32 to vector<8x1xf32>
    %51 = arith.mulf %50, %49 : vector<8x1xf32>
    %52 = arith.addf %33, %51 : vector<8x1xf32>
    %c2 = arith.constant 2 : index
    %c0_20 = arith.constant 0 : index
    %c0_21 = arith.constant 0 : index
    %53 = vector.load %arg3[%c2, %c0_20, %c0_21] : memref<4x8x32xbf16, #tpu.memory_space<vmem>>, vector<1x8x32xbf16>
    %54 = vector.shape_cast %53 : vector<1x8x32xbf16> to vector<8x32xbf16>
    %55 = arith.extf %54 : vector<8x32xbf16> to vector<8x32xf32>
    %56 = arith.mulf %1, %55 : vector<8x32xf32>
    %cst_22 = arith.constant dense<0.000000e+00> : vector<8xf32>
    %57 = vector.multi_reduction <add>, %56, %cst_22 [1] : vector<8x32xf32> to vector<8xf32>
    %58 = vector.shape_cast %57 : vector<8xf32> to vector<8x1xf32>
    %cst_23 = arith.constant 0.000000e+00 : f32
    %59 = vector.broadcast %cst_23 : f32 to vector<8x1xf32>
    %60 = arith.subf %59, %58 : vector<8x1xf32>
    %cst_24 = arith.constant 0.000000e+00 : f32
    %61 = vector.broadcast %cst_24 : f32 to vector<8x1xf32>
    %62 = arith.minimumf %60, %61 : vector<8x1xf32>
    %63 = math.absf %60 : vector<8x1xf32>
    %cst_25 = arith.constant 0.000000e+00 : f32
    %64 = vector.broadcast %cst_25 : f32 to vector<8x1xf32>
    %65 = arith.subf %64, %63 : vector<8x1xf32>
    %66 = math.exp %65 : vector<8x1xf32>
    %67 = math.log1p %66 : vector<8x1xf32>
    %68 = arith.subf %62, %67 : vector<8x1xf32>
    %cst_26 = arith.constant 2.500000e-01 : f32
    %69 = vector.broadcast %cst_26 : f32 to vector<8x1xf32>
    %70 = arith.mulf %69, %68 : vector<8x1xf32>
    %71 = arith.addf %52, %70 : vector<8x1xf32>
    %c3 = arith.constant 3 : index
    %c0_27 = arith.constant 0 : index
    %c0_28 = arith.constant 0 : index
    %72 = vector.load %arg3[%c3, %c0_27, %c0_28] : memref<4x8x32xbf16, #tpu.memory_space<vmem>>, vector<1x8x32xbf16>
    %73 = vector.shape_cast %72 : vector<1x8x32xbf16> to vector<8x32xbf16>
    %74 = arith.extf %73 : vector<8x32xbf16> to vector<8x32xf32>
    %75 = arith.mulf %1, %74 : vector<8x32xf32>
    %cst_29 = arith.constant dense<0.000000e+00> : vector<8xf32>
    %76 = vector.multi_reduction <add>, %75, %cst_29 [1] : vector<8x32xf32> to vector<8xf32>
    %77 = vector.shape_cast %76 : vector<8xf32> to vector<8x1xf32>
    %cst_30 = arith.constant 0.000000e+00 : f32
    %78 = vector.broadcast %cst_30 : f32 to vector<8x1xf32>
    %79 = arith.subf %78, %77 : vector<8x1xf32>
    %cst_31 = arith.constant 0.000000e+00 : f32
    %80 = vector.broadcast %cst_31 : f32 to vector<8x1xf32>
    %81 = arith.minimumf %79, %80 : vector<8x1xf32>
    %82 = math.absf %79 : vector<8x1xf32>
    %cst_32 = arith.constant 0.000000e+00 : f32
    %83 = vector.broadcast %cst_32 : f32 to vector<8x1xf32>
    %84 = arith.subf %83, %82 : vector<8x1xf32>
    %85 = math.exp %84 : vector<8x1xf32>
    %86 = math.log1p %85 : vector<8x1xf32>
    %87 = arith.subf %81, %86 : vector<8x1xf32>
    %cst_33 = arith.constant 2.500000e-01 : f32
    %88 = vector.broadcast %cst_33 : f32 to vector<8x1xf32>
    %89 = arith.mulf %88, %87 : vector<8x1xf32>
    %90 = arith.addf %71, %89 : vector<8x1xf32>
    %cst_34 = arith.constant dense<0.000000e+00> : vector<1xf32>
    %91 = vector.multi_reduction <add>, %90, %cst_34 [0] : vector<8x1xf32> to vector<1xf32>
    %92 = vector.shape_cast %91 : vector<1xf32> to vector<1x1xf32>
    %93 = vector.shape_cast %92 : vector<1x1xf32> to vector<1x1x1xf32>
    %c0_35 = arith.constant 0 : index
    %c0_36 = arith.constant 0 : index
    %c0_37 = arith.constant 0 : index
    %94 = vector.load %arg4[%c0_35, %c0_36, %c0_37] : memref<1x1x1xf32, #tpu.memory_space<vmem>>, vector<1x1x1xf32>
    tpu.vector_store %arg4[%c0_35, %c0_36, %c0_37], %93 {strides = array<i32>} : memref<1x1x1xf32, #tpu.memory_space<vmem>>, vector<1x1x1xf32>,
    return
  }
  func.func @transform_0(%arg0: i32) -> (i32, i32) {
    %c0_i32 = arith.constant 0 : i32
    %c0_i32_0 = arith.constant 0 : i32
    return %arg0, %c0_i32 : i32, i32
  }
  func.func @transform_1(%arg0: i32) -> (i32, i32) {
    %c0_i32 = arith.constant 0 : i32
    %c0_i32_0 = arith.constant 0 : i32
    return %arg0, %c0_i32 : i32, i32
  }
  func.func @transform_2(%arg0: i32) -> (i32, i32, i32) {
    %c0_i32 = arith.constant 0 : i32
    %c0_i32_0 = arith.constant 0 : i32
    %c0_i32_1 = arith.constant 0 : i32
    return %c0_i32, %arg0, %c0_i32_0 : i32, i32, i32
  }
  func.func @transform_3(%arg0: i32) -> (i32, i32, i32) {
    %c0_i32 = arith.constant 0 : i32
    %c0_i32_0 = arith.constant 0 : i32
    %c0_i32_1 = arith.constant 0 : i32
    return %arg0, %c0_i32, %c0_i32_0 : i32, i32, i32
  }
}

</mosaic_0001>

<bundles_post_ra>
// kernel: _line_loss_from_tables.1
= control target key start
LH: loop header
LB: loop body
LE: loop exit
PB: predicated region body
PF: predicated region fallthrough
CT: control target
= control target key end

     0   :  { %s274_s0 = inlined_call_operand.vmem [shape: bf16[8,32], index: 0, kind: input, shape index: {}]   ;;  %s275_s1 = inlined_call_operand.vmem [shape: bf16[8,32], index: 1, kind: input, shape index: {}]   ;;  %s276_s2 = inlined_call_operand.vmem [shape: bf16[4,8,32], index: 2, kind: input, shape index: {}]   ;;  %s277_s3 = inlined_call_operand.hbm [shape: f32[1,1,1], index: 3, kind: output, shape index: {}]  }
   0x1   :  { %v15_v0 = vld [vmem:[%s274_s0] sm:$0xf]  ;;  %v161_v7 = vld [vmem:[%s276_s2 + $0x8] sm:$0xff]  }
   0x2   :  { %v39_v1 = vld [vmem:[%s276_s2] sm:$0xff]   ;;  %v16_v3 = vunpack.c.l.bf16 %v15_v0 }
   0x3   :  { %v17_v2 = vld [vmem:[%s275_s1] sm:$0xf]  ;;  %v40_v4 = vunpack.c.l.bf16 %v39_v1  ;;  %v65_v6 = vunpack.c.h.bf16 %v39_v1 }
   0x4   :  { %v18_v5 = vunpack.c.l.bf16 %v17_v2 }
   0x5   :  { %8 = vsyncpa [#allocation3], 0  ;;  %vm20_vm0 = vcmask 261120   ;;  %v90_v8 = vunpack.c.l.bf16 %v161_v7  ;;  %v41_v9 = vmul.f32 %v40_v4, %v16_v3  ;;  %v66_v11 = vmul.f32 %v65_v6, %v16_v3  ;;  %s206_s0 = smov [#allocation2]  }
   0x6   :  { %v19_v10 = vmul.f32 %v18_v5, %v16_v3  ;;  %v115_v12 = vunpack.c.h.bf16 %v161_v7  ;;  %s152_s1 = sshll.u32 %s206_s0, 4  ;;  %vm144_vm6 = vcmask 0   ;;  %s153_s1 = int_to_ptr.vmem [resolvable:$true] %s152_s1 }
   0x7   :  { %v91_v13 = vmul.f32 %v90_v8, %v16_v3  ;;  %v42_v14 = vsel %vm20_vm0, %v41_v9, 0.0  ;;  %v67_v16 = vsel %vm20_vm0, %v66_v11, 0.0  ;;  %s184_s2 = scalar_lea.vmem %s153_s1, 16  ;;  %s188_s20 = scalar_lea.vmem %s153_s1, 32 }
   0x8   :  { %v21_v15 = vsel %vm20_vm0, %v19_v10, 0.0  ;;  %43 = vadd.xlane.f32.xlu0 %v42_v14  ;;  %v116_v18 = vmul.f32 %v115_v12, %v16_v3  ;;  %p185_p0 = scmp.ne.s32.totalorder %s153_s1, %s184_s2  ;;  %p189_p1 = scmp.lt.s32.totalorder %s153_s1, %s153_s1 }
   0x9   :  { %22 = vadd.xlane.f32.xlu1 %v21_v15  ;;  %v92_v17 = vsel %vm20_vm0, %v91_v13, 0.0  ;;  %p190_p2 = scmp.lt.s32.totalorder %s188_s20, %s184_s2 }
   0xa   :  { %v117_v19 = vsel %vm20_vm0, %v116_v18, 0.0 }
   0xb   :  { %p191_p3 = por %p190_p2, %p189_p1 }
   0xc   :  { %68 = vadd.xlane.f32.xlu0 %v67_v16 }
   0xd   :  { %93 = vadd.xlane.f32.xlu1 %v92_v17  ;;  %p192_p4 = pnand %p191_p3, %p185_p0 }
  0x10   :  { %118 = vadd.xlane.f32.xlu0 %v117_v19 }
  0x91   :  { %v44_v20 = vpop.xlane.xlu0 %43 }
  0x92   :  { %v244_v21 = vpop.xlane.xlu1 %22  ;;  %v45_v22 = vsub.f32 0.0, %v44_v20 }
  0x93   :  { %v25_v23 = vand.u32 2147483647, %v244_v21  ;;  %v24_v9 = vmin.f32 %v244_v21, 0.0 }
  0x94   :  { %v47_v24 = vand.u32 2147483647, %v45_v22  ;;  %v46_v6 = vmin.f32 %v45_v22, 0.0 }
  0x95   :  { %v26_v25 = vsub.f32 0.0, %v25_v23  ;;  %v247_v26 = vpop.xlane.xlu0 %68 }
  0x96   :  { %v249_v27 = vpop.xlane.xlu1 %93  ;;  %v48_v28 = vsub.f32 0.0, %v47_v24  ;;  %v70_v30 = vsub.f32 0.0, %v247_v26 }
  0x97   :  { %v27_v29 = vmul.f32 1.442695, %v26_v25  ;;  %v95_v31 = vsub.f32 0.0, %v249_v27 }
  0x98   :  { %v49_v32 = vmul.f32 1.442695, %v48_v28  ;;  %v72_v33 = vand.u32 2147483647, %v70_v30  ;;  %v71_v15 = vmin.f32 %v70_v30, 0.0 }
  0x99   :  { %164 = vpow2.f32 %v27_v29  ;;  %v97_v34 = vand.u32 2147483647, %v95_v31  ;;  %v255_v35 = vpop.xlane.xlu0 %118  ;;  %v96_v26 = vmin.f32 %v95_v31, 0.0 }
  0x9a   :  { %166 = vpow2.f32 %v49_v32  ;;  %v73_v36 = vsub.f32 0.0, %v72_v33  ;;  %v120_v37 = vsub.f32 0.0, %v255_v35 }
  0x9b   :  { %v98_v38 = vsub.f32 0.0, %v97_v34 }
  0x9c   :  { %v74_v39 = vmul.f32 1.442695, %v73_v36  ;;  %v122_v40 = vand.u32 2147483647, %v120_v37 }
  0x9d   :  { %v99_v41 = vmul.f32 1.442695, %v98_v38 }
  0x9e   :  { %168 = vpow2.f32 %v74_v39  ;;  %v123_v42 = vsub.f32 0.0, %v122_v40  ;;  %v121_v40 = vmin.f32 %v120_v37, 0.0 }
  0x9f   :  { %170 = vpow2.f32 %v99_v41 }
  0xa0   :  { %v124_v43 = vmul.f32 1.442695, %v123_v42 }
  0xa2   :  { %172 = vpow2.f32 %v124_v43 }
  0xa6   :  { %v165_v44 = vpop.eup %164 }
  0xa7   :  { %v29_v45 = vadd.f32 1.0, %v165_v44  ;;  %v167_v46 = vpop.eup %166  ;;  %v32_v55 = vmul.f32 -0.5, %v165_v44  ;;  %v35_v0 = vand.u32 2147483647, %v165_v44 }
  0xa8   :  { %v51_v47 = vadd.f32 1.0, %v167_v46  ;;  %v54_v53 = vmul.f32 -0.5, %v167_v46  ;;  %v57_v59 = vand.u32 2147483647, %v167_v46 }
  0xa9   :  { %174 = vlog2.f32 %v29_v45  ;;  %v33_v61 = vadd.f32 1.0, %v32_v55  ;;  %vm261_vm2 = vcmp.lt.f32.partialorder %v35_v0, 0.0004427343 }
  0xaa   :  { %176 = vlog2.f32 %v51_v47  ;;  %v55_v56 = vadd.f32 1.0, %v54_v53  ;;  %vm58_vm1 = vcmp.lt.f32.partialorder %v57_v59, 0.0004427343 }
  0xab   :  { %v169_v48 = vpop.eup %168  ;;  %v34_v10 = vmul.f32 %v165_v44, %v33_v61 }
  0xac   :  { %v171_v49 = vpop.eup %170  ;;  %v76_v50 = vadd.f32 1.0, %v169_v48  ;;  %v79_v57 = vmul.f32 -0.5, %v169_v48  ;;  %v56_v63 = vmul.f32 %v167_v46, %v55_v56  ;;  %v82_v1 = vand.u32 2147483647, %v169_v48 }
  0xad   :  { %v101_v51 = vadd.f32 1.0, %v171_v49  ;;  %v104_v60 = vmul.f32 -0.5, %v171_v49  ;;  %v107_v11 = vand.u32 2147483647, %v171_v49 }
  0xae   :  { %178 = vlog2.f32 %v76_v50  ;;  %v80_v4 = vadd.f32 1.0, %v79_v57  ;;  %vm83_vm3 = vcmp.lt.f32.partialorder %v82_v1, 0.0004427343 }
  0xaf   :  { %v173_v52 = vpop.eup %172  ;;  %180 = vlog2.f32 %v101_v51  ;;  %v105_v7 = vadd.f32 1.0, %v104_v60  ;;  %vm108_vm4 = vcmp.lt.f32.partialorder %v107_v11, 0.0004427343 }
  0xb0   :  { %v126_v54 = vadd.f32 1.0, %v173_v52  ;;  %v129_v5 = vmul.f32 -0.5, %v173_v52  ;;  %v81_v19 = vmul.f32 %v169_v48, %v80_v4  ;;  %v132_v24 = vand.u32 2147483647, %v173_v52 }
  0xb1   :  { %v106_v21 = vmul.f32 %v171_v49, %v105_v7 }
  0xb2   :  { %182 = vlog2.f32 %v126_v54  ;;  %v130_v20 = vadd.f32 1.0, %v129_v5  ;;  %vm133_vm5 = vcmp.lt.f32.partialorder %v132_v24, 0.0004427343 }
  0xb4   :  { %v131_v36 = vmul.f32 %v173_v52, %v130_v20 }
  0xb6   :  { %v175_v58 = vpop.eup %174 }
  0xb7   :  { %v177_v62 = vpop.eup %176  ;;  %v31_v3 = vmul.f32 0.6931472, %v175_v58 }
  0xb8   :  { %v53_v2 = vmul.f32 0.6931472, %v177_v62 }
  0xb9   :  { %v37_v17 = vsel %vm261_vm2, %v34_v10, %v31_v3 }
  0xba   :  { %v59_v8 = vsel %vm58_vm1, %v56_v63, %v53_v2  ;;  %v38_v29 = vsub.f32 %v24_v9, %v37_v17 }
  0xbb   :  { %v179_v12 = vpop.eup %178  ;;  %v60_v13 = vsub.f32 %v46_v6, %v59_v8 }
  0xbc   :  { %v181_v16 = vpop.eup %180  ;;  %v78_v18 = vmul.f32 0.6931472, %v179_v12 }
  0xbd   :  { %v61_v22 = vmul.f32 0.25, %v60_v13  ;;  %v103_v23 = vmul.f32 0.6931472, %v181_v16 }
  0xbe   :  { %v84_v25 = vsel %vm83_vm3, %v81_v19, %v78_v18 }
  0xbf   :  { %v183_v28 = vpop.eup %182  ;;  %v85_v30 = vsub.f32 %v71_v15, %v84_v25  ;;  %v109_v32 = vsel %vm108_vm4, %v106_v21, %v103_v23  ;;  %v62_v38 = vadd.f32 %v61_v22, %v38_v29 }
  0xc0   :  { %v110_v33 = vsub.f32 %v96_v26, %v109_v32  ;;  %v128_v34 = vmul.f32 0.6931472, %v183_v28 }
  0xc1   :  { %v86_v39 = vmul.f32 0.25, %v85_v30 }
  0xc2   :  { %v134_v41 = vsel %vm133_vm5, %v131_v36, %v128_v34  ;;  %v111_v43 = vmul.f32 0.25, %v110_v33 }
  0xc3   :  { %v87_v42 = vadd.f32 %v86_v39, %v62_v38  ;;  %v135_v44 = vsub.f32 %v121_v40, %v134_v41 }
  0xc5   :  { %v112_v27 = vadd.f32 %v111_v43, %v87_v42  ;;  %v136_v31 = vmul.f32 0.25, %v135_v44 }
  0xc7   :  { %v137_v45 = vadd.f32 %v136_v31, %v112_v27 }
  0xc9   :  { %v138_v46 = vrot.slane %v137_v45, 4 }
  0xcb   :  { %v139_v47 = vadd.f32 %v138_v46, %v137_v45 }
  0xcd   :  { %v140_v48 = vrot.slane %v139_v47, 2 }
  0xcf   :  { %v141_v49 = vadd.f32 %v140_v48, %v139_v47 }
  0xd1   :  { %v142_v50 = vrot.slane %v141_v49, 1 }
  0xd3   :  { %v143_v51 = vadd.f32 %v142_v50, %v141_v49 }
  0xd5   :  { %145 = vst.msk [vmem:[#allocation2] sm:$0x1] %vm144_vm6, %v143_v51 }
  0xd6   :  { %195 = shalt.err (!%p192_p4)
}
  0xd7   :  { %155 = dma.vmem_to_hbm [thread:$0]  %s153_s1, 16, %s277_s3, [#allocation3]  }
  0xd8   :  { %204 = dma.done.wait [#allocation3], 16  }
  0xd9   :  { %205 = vsyncadd [#allocation3], 4294967280 }
  0xda   :  { %159 = vsyncpa [#allocation3], 1 }

</bundles_post_ra>
